<compile_context>
chip_gen: v5e
topology: v5e:2x2
jax: 0.10.0
libtpu: 0.0.40
codegen_flags: <defaults>
</compile_context>

<pallas_src>
import functools

import jax
import jax.numpy as jnp
from jax.experimental import pallas as pl
from jax.experimental.pallas import tpu as pltpu

LANE = 128


def _round_up(x, m):
    return (x + m - 1) // m * m


def mlp_kernel(seqs_ref,                 # SMEM (B, S) int32   (scalar prefetch)
               emb_ref,                  # VMEM (V, E) f32     (whole table resident)
               w1_ref, b1_ref,           # VMEM (E, H), (1, H)
               w2_ref, b2_ref,           # VMEM (H, OP), (1, OP)   OP = padded O
               out_ref,                  # VMEM (B, OP)
               sum_ref):                 # VMEM (B, E) scratch: per-row embedding sums
    B, S = seqs_ref.shape
    E = emb_ref.shape[1]

    # Embedding gather + sum over the sequence axis, straight off the resident
    # VMEM table (no per-token HBM DMAs). The mean's 1/S is folded into w1.
    for b in range(B):
        acc = jnp.zeros((1, E), jnp.float32)
        for s in range(S):
            tok = seqs_ref[b, s]
            acc = acc + emb_ref[pl.ds(tok, 1), :]
        sum_ref[b:b + 1, :] = acc

    # fc1 -> fc2 -> sigmoid -> softmax(dim=0), all in one grid step.
    x = sum_ref[...]                                                    # (B, E)
    h = jnp.dot(x, w1_ref[...],
                preferred_element_type=jnp.float32) + b1_ref[...]       # (B, H)
    o = jnp.dot(h, w2_ref[...],
                preferred_element_type=jnp.float32) + b2_ref[...]       # (B, OP)
    sg = 0.5 * jnp.tanh(0.5 * o) + 0.5                                  # sigmoid (EUP)
    # sigmoid output is in (0,1) -> exp cannot overflow; skip max-subtraction.
    e = jnp.exp(sg)
    denom = jnp.sum(e, axis=0, keepdims=True)
    # Exact divide for fp32 parity. Zero-padded output columns get their own
    # softmax column over dim=0 (they never contaminate real columns) and are
    # sliced off in the wrapper.
    out_ref[...] = e / denom


@functools.partial(jax.jit, static_argnums=(7,))
def mlp_forward(seqs, lens, emb_table, w1_scaled, b1_row, w2_pad, b2_pad,
                output_size):
    """Pallas forward. `lens` kept for API parity with the PyTorch module but
    unused (the module's forward does a plain mean over the full seq dim)."""
    del lens
    B, S = seqs.shape
    V, E = emb_table.shape
    H = w1_scaled.shape[1]
    OP = w2_pad.shape[1]

    grid_spec = pltpu.PrefetchScalarGridSpec(
        num_scalar_prefetch=1,                       # seqs -> SMEM for the gather
        grid=(1,),                                   # single step: no grid overhead
        in_specs=[
            pl.BlockSpec((V, E), lambda i, seqs_ref: (0, 0)),   # resident emb table
            pl.BlockSpec((E, H), lambda i, seqs_ref: (0, 0)),   # resident weights
            pl.BlockSpec((1, H), lambda i, seqs_ref: (0, 0)),
            pl.BlockSpec((H, OP), lambda i, seqs_ref: (0, 0)),
            pl.BlockSpec((1, OP), lambda i, seqs_ref: (0, 0)),
        ],
        out_specs=pl.BlockSpec((B, OP), lambda i, seqs_ref: (0, 0)),  # lane-dense
        scratch_shapes=[
            pltpu.VMEM((B, E), jnp.float32),         # summed embeddings per batch row
        ],
    )

    out_pad = pl.pallas_call(
        mlp_kernel,
        out_shape=jax.ShapeDtypeStruct((B, OP), jnp.float32),
        grid_spec=grid_spec,
        compiler_params=pltpu.CompilerParams(
            # softmax(dim=0) couples batch rows -> single arbitrary step.
            dimension_semantics=("arbitrary",),
        ),
    )(seqs, emb_table, w1_scaled, b1_row, w2_pad, b2_pad)

    return out_pad[:, :output_size]


def make_params(key, vocab_size, embedding_dim, hidden_size, output_size):
    k_emb, k_w1, k_b1, k_w2, k_b2 = jax.random.split(key, 5)
    emb = jax.random.normal(k_emb, (vocab_size, embedding_dim), jnp.float32)
    emb = emb.at[0].set(0.0)                         # padding_idx=0 -> zero row
    lim1 = 1.0 / jnp.sqrt(embedding_dim)
    lim2 = 1.0 / jnp.sqrt(hidden_size)
    w1 = jax.random.uniform(k_w1, (embedding_dim, hidden_size), jnp.float32, -lim1, lim1)
    b1 = jax.random.uniform(k_b1, (hidden_size,), jnp.float32, -lim1, lim1)
    w2 = jax.random.uniform(k_w2, (hidden_size, output_size), jnp.float32, -lim2, lim2)
    b2 = jax.random.uniform(k_b2, (output_size,), jnp.float32, -lim2, lim2)
    return emb, w1, b1, w2, b2


def prepare_params(w1, b1, w2, b2, seq_len):
    """One-time constant folding / layout prep:
       - fold mean's 1/S into fc1 weights (kernel uses sum @ (w1/S)),
       - pad fc2 output columns to a 128-lane multiple with zeros."""
    O = w2.shape[1]
    OP = max(LANE, _round_up(O, LANE))
    w1_scaled = w1 / jnp.float32(seq_len)
    b1_row = b1.reshape(1, -1)
    w2_pad = jnp.zeros((w2.shape[0], OP), w2.dtype).at[:, :O].set(w2)
    b2_pad = jnp.zeros((1, OP), b2.dtype).at[:, :O].set(b2.reshape(1, -1))
    return w1_scaled, b1_row, w2_pad, b2_pad


if __name__ == "__main__":
    batch, seq_len = 4, 8
    vocab_size, embedding_dim, hidden_size, output_size = 32, 16, 32, 8

    key = jax.random.PRNGKey(0)
    k_params, k_seqs = jax.random.split(key)
    emb, w1, b1, w2, b2 = make_params(k_params, vocab_size, embedding_dim,
                                      hidden_size, output_size)
    w1s, b1r, w2p, b2p = prepare_params(w1, b1, w2, b2, seq_len)

    seqs = jax.random.randint(k_seqs, (batch, seq_len), 0, vocab_size,
                              dtype=jnp.int32)
    lens = jnp.full((batch,), seq_len, dtype=jnp.int32)

    out = mlp_forward(seqs, lens, emb, w1s, b1r, w2p, b2p, output_size)
    jax.block_until_ready(out)

    # Plain-JAX reference matching the PyTorch forward exactly:
    # embedding -> mean(dim=1) -> fc1 -> fc2 -> sigmoid -> softmax(dim=0)
    embeds = jnp.take(emb, seqs, axis=0)
    mean = embeds.mean(axis=1)
    logits = (mean @ w1 + b1.reshape(1, -1)) @ w2 + b2.reshape(1, -1)
    ref = jax.nn.softmax(jax.nn.sigmoid(logits), axis=0)

    assert out.shape == (batch, output_size)
    assert jnp.allclose(out, ref, atol=1e-3, rtol=1e-3), "mismatch vs reference"

    print("KERNEL_OK")
</pallas_src>

<mosaic_0001>
module attributes {stable_mosaic.version = 11 : i64} {
  func.func @mlp_kernel(%arg0: i32, %arg1: memref<4x8xi32, #tpu.memory_space<smem>>, %arg2: memref<32x16xf32, #tpu.memory_space<vmem>>, %arg3: memref<16x32xf32, #tpu.memory_space<vmem>>, %arg4: memref<1x32xf32, #tpu.memory_space<vmem>>, %arg5: memref<32x128xf32, #tpu.memory_space<vmem>>, %arg6: memref<1x128xf32, #tpu.memory_space<vmem>>, %arg7: memref<4x128xf32, #tpu.memory_space<vmem>>, %arg8: memref<4x16xf32, #tpu.memory_space<vmem>>) attributes {dimension_semantics = [#tpu.dimension_semantics<arbitrary>], iteration_bounds = array<i64: 1>, scalar_prefetch = 1 : i64, scratch_operands = 1 : i64, tpu.core_type = #tpu.core_type<tc>, window_params = [{pipeline_mode = #tpu.pipeline_mode<synchronous>, transform_indices = @transform_0, window_bounds = array<i64: 32, 16>}, {pipeline_mode = #tpu.pipeline_mode<synchronous>, transform_indices = @transform_1, window_bounds = array<i64: 16, 32>}, {pipeline_mode = #tpu.pipeline_mode<synchronous>, transform_indices = @transform_2, window_bounds = array<i64: 1, 32>}, {pipeline_mode = #tpu.pipeline_mode<synchronous>, transform_indices = @transform_3, window_bounds = array<i64: 32, 128>}, {pipeline_mode = #tpu.pipeline_mode<synchronous>, transform_indices = @transform_4, window_bounds = array<i64: 1, 128>}, {pipeline_mode = #tpu.pipeline_mode<synchronous>, transform_indices = @transform_5, window_bounds = array<i64: 4, 128>}]} {
    %cst = arith.constant 0.000000e+00 : f32
    %0 = vector.broadcast %cst : f32 to vector<1x16xf32>
    %c0 = arith.constant 0 : index
    %c0_0 = arith.constant 0 : index
    %1 = memref.load %arg1[%c0, %c0_0] : memref<4x8xi32, #tpu.memory_space<smem>>
    %2 = arith.index_cast %1 : i32 to index
    %c0_1 = arith.constant 0 : index
    %3 = vector.load %arg2[%2, %c0_1] : memref<32x16xf32, #tpu.memory_space<vmem>>, vector<1x16xf32>
    %4 = arith.addf %0, %3 : vector<1x16xf32>
    %c0_2 = arith.constant 0 : index
    %c1 = arith.constant 1 : index
    %5 = memref.load %arg1[%c0_2, %c1] : memref<4x8xi32, #tpu.memory_space<smem>>
    %6 = arith.index_cast %5 : i32 to index
    %c0_3 = arith.constant 0 : index
    %7 = vector.load %arg2[%6, %c0_3] : memref<32x16xf32, #tpu.memory_space<vmem>>, vector<1x16xf32>
    %8 = arith.addf %4, %7 : vector<1x16xf32>
    %c0_4 = arith.constant 0 : index
    %c2 = arith.constant 2 : index
    %9 = memref.load %arg1[%c0_4, %c2] : memref<4x8xi32, #tpu.memory_space<smem>>
    %10 = arith.index_cast %9 : i32 to index
    %c0_5 = arith.constant 0 : index
    %11 = vector.load %arg2[%10, %c0_5] : memref<32x16xf32, #tpu.memory_space<vmem>>, vector<1x16xf32>
    %12 = arith.addf %8, %11 : vector<1x16xf32>
    %c0_6 = arith.constant 0 : index
    %c3 = arith.constant 3 : index
    %13 = memref.load %arg1[%c0_6, %c3] : memref<4x8xi32, #tpu.memory_space<smem>>
    %14 = arith.index_cast %13 : i32 to index
    %c0_7 = arith.constant 0 : index
    %15 = vector.load %arg2[%14, %c0_7] : memref<32x16xf32, #tpu.memory_space<vmem>>, vector<1x16xf32>
    %16 = arith.addf %12, %15 : vector<1x16xf32>
    %c0_8 = arith.constant 0 : index
    %c4 = arith.constant 4 : index
    %17 = memref.load %arg1[%c0_8, %c4] : memref<4x8xi32, #tpu.memory_space<smem>>
    %18 = arith.index_cast %17 : i32 to index
    %c0_9 = arith.constant 0 : index
    %19 = vector.load %arg2[%18, %c0_9] : memref<32x16xf32, #tpu.memory_space<vmem>>, vector<1x16xf32>
    %20 = arith.addf %16, %19 : vector<1x16xf32>
    %c0_10 = arith.constant 0 : index
    %c5 = arith.constant 5 : index
    %21 = memref.load %arg1[%c0_10, %c5] : memref<4x8xi32, #tpu.memory_space<smem>>
    %22 = arith.index_cast %21 : i32 to index
    %c0_11 = arith.constant 0 : index
    %23 = vector.load %arg2[%22, %c0_11] : memref<32x16xf32, #tpu.memory_space<vmem>>, vector<1x16xf32>
    %24 = arith.addf %20, %23 : vector<1x16xf32>
    %c0_12 = arith.constant 0 : index
    %c6 = arith.constant 6 : index
    %25 = memref.load %arg1[%c0_12, %c6] : memref<4x8xi32, #tpu.memory_space<smem>>
    %26 = arith.index_cast %25 : i32 to index
    %c0_13 = arith.constant 0 : index
    %27 = vector.load %arg2[%26, %c0_13] : memref<32x16xf32, #tpu.memory_space<vmem>>, vector<1x16xf32>
    %28 = arith.addf %24, %27 : vector<1x16xf32>
    %c0_14 = arith.constant 0 : index
    %c7 = arith.constant 7 : index
    %29 = memref.load %arg1[%c0_14, %c7] : memref<4x8xi32, #tpu.memory_space<smem>>
    %30 = arith.index_cast %29 : i32 to index
    %c0_15 = arith.constant 0 : index
    %31 = vector.load %arg2[%30, %c0_15] : memref<32x16xf32, #tpu.memory_space<vmem>>, vector<1x16xf32>
    %32 = arith.addf %28, %31 : vector<1x16xf32>
    %c0_16 = arith.constant 0 : index
    %c0_17 = arith.constant 0 : index
    %33 = vector.load %arg8[%c0_16, %c0_17] : memref<4x16xf32, #tpu.memory_space<vmem>>, vector<1x16xf32>
    tpu.vector_store %arg8[%c0_16, %c0_17], %32 {strides = array<i32>} : memref<4x16xf32, #tpu.memory_space<vmem>>, vector<1x16xf32>,
    %cst_18 = arith.constant 0.000000e+00 : f32
    %34 = vector.broadcast %cst_18 : f32 to vector<1x16xf32>
    %c1_19 = arith.constant 1 : index
    %c0_20 = arith.constant 0 : index
    %35 = memref.load %arg1[%c1_19, %c0_20] : memref<4x8xi32, #tpu.memory_space<smem>>
    %36 = arith.index_cast %35 : i32 to index
    %c0_21 = arith.constant 0 : index
    %37 = vector.load %arg2[%36, %c0_21] : memref<32x16xf32, #tpu.memory_space<vmem>>, vector<1x16xf32>
    %38 = arith.addf %34, %37 : vector<1x16xf32>
    %c1_22 = arith.constant 1 : index
    %c1_23 = arith.constant 1 : index
    %39 = memref.load %arg1[%c1_22, %c1_23] : memref<4x8xi32, #tpu.memory_space<smem>>
    %40 = arith.index_cast %39 : i32 to index
    %c0_24 = arith.constant 0 : index
    %41 = vector.load %arg2[%40, %c0_24] : memref<32x16xf32, #tpu.memory_space<vmem>>, vector<1x16xf32>
    %42 = arith.addf %38, %41 : vector<1x16xf32>
    %c1_25 = arith.constant 1 : index
    %c2_26 = arith.constant 2 : index
    %43 = memref.load %arg1[%c1_25, %c2_26] : memref<4x8xi32, #tpu.memory_space<smem>>
    %44 = arith.index_cast %43 : i32 to index
    %c0_27 = arith.constant 0 : index
    %45 = vector.load %arg2[%44, %c0_27] : memref<32x16xf32, #tpu.memory_space<vmem>>, vector<1x16xf32>
    %46 = arith.addf %42, %45 : vector<1x16xf32>
    %c1_28 = arith.constant 1 : index
    %c3_29 = arith.constant 3 : index
    %47 = memref.load %arg1[%c1_28, %c3_29] : memref<4x8xi32, #tpu.memory_space<smem>>
    %48 = arith.index_cast %47 : i32 to index
    %c0_30 = arith.constant 0 : index
    %49 = vector.load %arg2[%48, %c0_30] : memref<32x16xf32, #tpu.memory_space<vmem>>, vector<1x16xf32>
    %50 = arith.addf %46, %49 : vector<1x16xf32>
    %c1_31 = arith.constant 1 : index
    %c4_32 = arith.constant 4 : index
    %51 = memref.load %arg1[%c1_31, %c4_32] : memref<4x8xi32, #tpu.memory_space<smem>>
    %52 = arith.index_cast %51 : i32 to index
    %c0_33 = arith.constant 0 : index
    %53 = vector.load %arg2[%52, %c0_33] : memref<32x16xf32, #tpu.memory_space<vmem>>, vector<1x16xf32>
    %54 = arith.addf %50, %53 : vector<1x16xf32>
    %c1_34 = arith.constant 1 : index
    %c5_35 = arith.constant 5 : index
    %55 = memref.load %arg1[%c1_34, %c5_35] : memref<4x8xi32, #tpu.memory_space<smem>>
    %56 = arith.index_cast %55 : i32 to index
    %c0_36 = arith.constant 0 : index
    %57 = vector.load %arg2[%56, %c0_36] : memref<32x16xf32, #tpu.memory_space<vmem>>, vector<1x16xf32>
    %58 = arith.addf %54, %57 : vector<1x16xf32>
    %c1_37 = arith.constant 1 : index
    %c6_38 = arith.constant 6 : index
    %59 = memref.load %arg1[%c1_37, %c6_38] : memref<4x8xi32, #tpu.memory_space<smem>>
    %60 = arith.index_cast %59 : i32 to index
    %c0_39 = arith.constant 0 : index
    %61 = vector.load %arg2[%60, %c0_39] : memref<32x16xf32, #tpu.memory_space<vmem>>, vector<1x16xf32>
    %62 = arith.addf %58, %61 : vector<1x16xf32>
    %c1_40 = arith.constant 1 : index
    %c7_41 = arith.constant 7 : index
    %63 = memref.load %arg1[%c1_40, %c7_41] : memref<4x8xi32, #tpu.memory_space<smem>>
    %64 = arith.index_cast %63 : i32 to index
    %c0_42 = arith.constant 0 : index
    %65 = vector.load %arg2[%64, %c0_42] : memref<32x16xf32, #tpu.memory_space<vmem>>, vector<1x16xf32>
    %66 = arith.addf %62, %65 : vector<1x16xf32>
    %c1_43 = arith.constant 1 : index
    %c0_44 = arith.constant 0 : index
    %67 = vector.load %arg8[%c1_43, %c0_44] : memref<4x16xf32, #tpu.memory_space<vmem>>, vector<1x16xf32>
    tpu.vector_store %arg8[%c1_43, %c0_44], %66 {strides = array<i32>} : memref<4x16xf32, #tpu.memory_space<vmem>>, vector<1x16xf32>,
    %cst_45 = arith.constant 0.000000e+00 : f32
    %68 = vector.broadcast %cst_45 : f32 to vector<1x16xf32>
    %c2_46 = arith.constant 2 : index
    %c0_47 = arith.constant 0 : index
    %69 = memref.load %arg1[%c2_46, %c0_47] : memref<4x8xi32, #tpu.memory_space<smem>>
    %70 = arith.index_cast %69 : i32 to index
    %c0_48 = arith.constant 0 : index
    %71 = vector.load %arg2[%70, %c0_48] : memref<32x16xf32, #tpu.memory_space<vmem>>, vector<1x16xf32>
    %72 = arith.addf %68, %71 : vector<1x16xf32>
    %c2_49 = arith.constant 2 : index
    %c1_50 = arith.constant 1 : index
    %73 = memref.load %arg1[%c2_49, %c1_50] : memref<4x8xi32, #tpu.memory_space<smem>>
    %74 = arith.index_cast %73 : i32 to index
    %c0_51 = arith.constant 0 : index
    %75 = vector.load %arg2[%74, %c0_51] : memref<32x16xf32, #tpu.memory_space<vmem>>, vector<1x16xf32>
    %76 = arith.addf %72, %75 : vector<1x16xf32>
    %c2_52 = arith.constant 2 : index
    %c2_53 = arith.constant 2 : index
    %77 = memref.load %arg1[%c2_52, %c2_53] : memref<4x8xi32, #tpu.memory_space<smem>>
    %78 = arith.index_cast %77 : i32 to index
    %c0_54 = arith.constant 0 : index
    %79 = vector.load %arg2[%78, %c0_54] : memref<32x16xf32, #tpu.memory_space<vmem>>, vector<1x16xf32>
    %80 = arith.addf %76, %79 : vector<1x16xf32>
    %c2_55 = arith.constant 2 : index
    %c3_56 = arith.constant 3 : index
    %81 = memref.load %arg1[%c2_55, %c3_56] : memref<4x8xi32, #tpu.memory_space<smem>>
    %82 = arith.index_cast %81 : i32 to index
    %c0_57 = arith.constant 0 : index
    %83 = vector.load %arg2[%82, %c0_57] : memref<32x16xf32, #tpu.memory_space<vmem>>, vector<1x16xf32>
    %84 = arith.addf %80, %83 : vector<1x16xf32>
    %c2_58 = arith.constant 2 : index
    %c4_59 = arith.constant 4 : index
    %85 = memref.load %arg1[%c2_58, %c4_59] : memref<4x8xi32, #tpu.memory_space<smem>>
    %86 = arith.index_cast %85 : i32 to index
    %c0_60 = arith.constant 0 : index
    %87 = vector.load %arg2[%86, %c0_60] : memref<32x16xf32, #tpu.memory_space<vmem>>, vector<1x16xf32>
    %88 = arith.addf %84, %87 : vector<1x16xf32>
    %c2_61 = arith.constant 2 : index
    %c5_62 = arith.constant 5 : index
    %89 = memref.load %arg1[%c2_61, %c5_62] : memref<4x8xi32, #tpu.memory_space<smem>>
    %90 = arith.index_cast %89 : i32 to index
    %c0_63 = arith.constant 0 : index
    %91 = vector.load %arg2[%90, %c0_63] : memref<32x16xf32, #tpu.memory_space<vmem>>, vector<1x16xf32>
    %92 = arith.addf %88, %91 : vector<1x16xf32>
    %c2_64 = arith.constant 2 : index
    %c6_65 = arith.constant 6 : index
    %93 = memref.load %arg1[%c2_64, %c6_65] : memref<4x8xi32, #tpu.memory_space<smem>>
    %94 = arith.index_cast %93 : i32 to index
    %c0_66 = arith.constant 0 : index
    %95 = vector.load %arg2[%94, %c0_66] : memref<32x16xf32, #tpu.memory_space<vmem>>, vector<1x16xf32>
    %96 = arith.addf %92, %95 : vector<1x16xf32>
    %c2_67 = arith.constant 2 : index
    %c7_68 = arith.constant 7 : index
    %97 = memref.load %arg1[%c2_67, %c7_68] : memref<4x8xi32, #tpu.memory_space<smem>>
    %98 = arith.index_cast %97 : i32 to index
    %c0_69 = arith.constant 0 : index
    %99 = vector.load %arg2[%98, %c0_69] : memref<32x16xf32, #tpu.memory_space<vmem>>, vector<1x16xf32>
    %100 = arith.addf %96, %99 : vector<1x16xf32>
    %c2_70 = arith.constant 2 : index
    %c0_71 = arith.constant 0 : index
    %101 = vector.load %arg8[%c2_70, %c0_71] : memref<4x16xf32, #tpu.memory_space<vmem>>, vector<1x16xf32>
    tpu.vector_store %arg8[%c2_70, %c0_71], %100 {strides = array<i32>} : memref<4x16xf32, #tpu.memory_space<vmem>>, vector<1x16xf32>,
    %cst_72 = arith.constant 0.000000e+00 : f32
    %102 = vector.broadcast %cst_72 : f32 to vector<1x16xf32>
    %c3_73 = arith.constant 3 : index
    %c0_74 = arith.constant 0 : index
    %103 = memref.load %arg1[%c3_73, %c0_74] : memref<4x8xi32, #tpu.memory_space<smem>>
    %104 = arith.index_cast %103 : i32 to index
    %c0_75 = arith.constant 0 : index
    %105 = vector.load %arg2[%104, %c0_75] : memref<32x16xf32, #tpu.memory_space<vmem>>, vector<1x16xf32>
    %106 = arith.addf %102, %105 : vector<1x16xf32>
    %c3_76 = arith.constant 3 : index
    %c1_77 = arith.constant 1 : index
    %107 = memref.load %arg1[%c3_76, %c1_77] : memref<4x8xi32, #tpu.memory_space<smem>>
    %108 = arith.index_cast %107 : i32 to index
    %c0_78 = arith.constant 0 : index
    %109 = vector.load %arg2[%108, %c0_78] : memref<32x16xf32, #tpu.memory_space<vmem>>, vector<1x16xf32>
    %110 = arith.addf %106, %109 : vector<1x16xf32>
    %c3_79 = arith.constant 3 : index
    %c2_80 = arith.constant 2 : index
    %111 = memref.load %arg1[%c3_79, %c2_80] : memref<4x8xi32, #tpu.memory_space<smem>>
    %112 = arith.index_cast %111 : i32 to index
    %c0_81 = arith.constant 0 : index
    %113 = vector.load %arg2[%112, %c0_81] : memref<32x16xf32, #tpu.memory_space<vmem>>, vector<1x16xf32>
    %114 = arith.addf %110, %113 : vector<1x16xf32>
    %c3_82 = arith.constant 3 : index
    %c3_83 = arith.constant 3 : index
    %115 = memref.load %arg1[%c3_82, %c3_83] : memref<4x8xi32, #tpu.memory_space<smem>>
    %116 = arith.index_cast %115 : i32 to index
    %c0_84 = arith.constant 0 : index
    %117 = vector.load %arg2[%116, %c0_84] : memref<32x16xf32, #tpu.memory_space<vmem>>, vector<1x16xf32>
    %118 = arith.addf %114, %117 : vector<1x16xf32>
    %c3_85 = arith.constant 3 : index
    %c4_86 = arith.constant 4 : index
    %119 = memref.load %arg1[%c3_85, %c4_86] : memref<4x8xi32, #tpu.memory_space<smem>>
    %120 = arith.index_cast %119 : i32 to index
    %c0_87 = arith.constant 0 : index
    %121 = vector.load %arg2[%120, %c0_87] : memref<32x16xf32, #tpu.memory_space<vmem>>, vector<1x16xf32>
    %122 = arith.addf %118, %121 : vector<1x16xf32>
    %c3_88 = arith.constant 3 : index
    %c5_89 = arith.constant 5 : index
    %123 = memref.load %arg1[%c3_88, %c5_89] : memref<4x8xi32, #tpu.memory_space<smem>>
    %124 = arith.index_cast %123 : i32 to index
    %c0_90 = arith.constant 0 : index
    %125 = vector.load %arg2[%124, %c0_90] : memref<32x16xf32, #tpu.memory_space<vmem>>, vector<1x16xf32>
    %126 = arith.addf %122, %125 : vector<1x16xf32>
    %c3_91 = arith.constant 3 : index
    %c6_92 = arith.constant 6 : index
    %127 = memref.load %arg1[%c3_91, %c6_92] : memref<4x8xi32, #tpu.memory_space<smem>>
    %128 = arith.index_cast %127 : i32 to index
    %c0_93 = arith.constant 0 : index
    %129 = vector.load %arg2[%128, %c0_93] : memref<32x16xf32, #tpu.memory_space<vmem>>, vector<1x16xf32>
    %130 = arith.addf %126, %129 : vector<1x16xf32>
    %c3_94 = arith.constant 3 : index
    %c7_95 = arith.constant 7 : index
    %131 = memref.load %arg1[%c3_94, %c7_95] : memref<4x8xi32, #tpu.memory_space<smem>>
    %132 = arith.index_cast %131 : i32 to index
    %c0_96 = arith.constant 0 : index
    %133 = vector.load %arg2[%132, %c0_96] : memref<32x16xf32, #tpu.memory_space<vmem>>, vector<1x16xf32>
    %134 = arith.addf %130, %133 : vector<1x16xf32>
    %c3_97 = arith.constant 3 : index
    %c0_98 = arith.constant 0 : index
    %135 = vector.load %arg8[%c3_97, %c0_98] : memref<4x16xf32, #tpu.memory_space<vmem>>, vector<1x16xf32>
    tpu.vector_store %arg8[%c3_97, %c0_98], %134 {strides = array<i32>} : memref<4x16xf32, #tpu.memory_space<vmem>>, vector<1x16xf32>,
    %c0_99 = arith.constant 0 : index
    %c0_100 = arith.constant 0 : index
    %136 = vector.load %arg8[%c0_99, %c0_100] : memref<4x16xf32, #tpu.memory_space<vmem>>, vector<4x16xf32>
    %c0_101 = arith.constant 0 : index
    %c0_102 = arith.constant 0 : index
    %137 = vector.load %arg3[%c0_101, %c0_102] : memref<16x32xf32, #tpu.memory_space<vmem>>, vector<16x32xf32>
    %cst_103 = arith.constant dense<0.000000e+00> : vector<4x32xf32>
    %138 = tpu.matmul %136, %137, %cst_103 {dimension_numbers = #tpu.dot_dimension_numbers<[1], [0], [0], [1], [0, 0, 1, 1], [], []>} : vector<4x16xf32>, vector<16x32xf32>, vector<4x32xf32> -> vector<4x32xf32>
    %c0_104 = arith.constant 0 : index
    %c0_105 = arith.constant 0 : index
    %139 = vector.load %arg4[%c0_104, %c0_105] : memref<1x32xf32, #tpu.memory_space<vmem>>, vector<1x32xf32>
    %140 = vector.broadcast %139 : vector<1x32xf32> to vector<4x32xf32>
    %141 = arith.addf %138, %140 : vector<4x32xf32>
    %c0_106 = arith.constant 0 : index
    %c0_107 = arith.constant 0 : index
    %142 = vector.load %arg5[%c0_106, %c0_107] : memref<32x128xf32, #tpu.memory_space<vmem>>, vector<32x128xf32>
    %cst_108 = arith.constant dense<0.000000e+00> : vector<4x128xf32>
    %143 = tpu.matmul %141, %142, %cst_108 {dimension_numbers = #tpu.dot_dimension_numbers<[1], [0], [0], [1], [0, 0, 1, 1], [], []>} : vector<4x32xf32>, vector<32x128xf32>, vector<4x128xf32> -> vector<4x128xf32>
    %c0_109 = arith.constant 0 : index
    %c0_110 = arith.constant 0 : index
    %144 = vector.load %arg6[%c0_109, %c0_110] : memref<1x128xf32, #tpu.memory_space<vmem>>, vector<1x128xf32>
    %145 = vector.broadcast %144 : vector<1x128xf32> to vector<4x128xf32>
    %146 = arith.addf %143, %145 : vector<4x128xf32>
    %cst_111 = arith.constant 5.000000e-01 : f32
    %147 = vector.broadcast %cst_111 : f32 to vector<4x128xf32>
    %148 = arith.mulf %147, %146 : vector<4x128xf32>
    %149 = math.tanh %148 : vector<4x128xf32>
    %cst_112 = arith.constant 5.000000e-01 : f32
    %150 = vector.broadcast %cst_112 : f32 to vector<4x128xf32>
    %151 = arith.mulf %150, %149 : vector<4x128xf32>
    %cst_113 = arith.constant 5.000000e-01 : f32
    %152 = vector.broadcast %cst_113 : f32 to vector<4x128xf32>
    %153 = arith.addf %151, %152 : vector<4x128xf32>
    %154 = math.exp %153 : vector<4x128xf32>
    %cst_114 = arith.constant dense<0.000000e+00> : vector<128xf32>
    %155 = vector.multi_reduction <add>, %154, %cst_114 [0] : vector<4x128xf32> to vector<128xf32>
    %156 = vector.shape_cast %155 : vector<128xf32> to vector<1x128xf32>
    %157 = vector.broadcast %156 : vector<1x128xf32> to vector<4x128xf32>
    %158 = arith.divf %154, %157 : vector<4x128xf32>
    %c0_115 = arith.constant 0 : index
    %c0_116 = arith.constant 0 : index
    %159 = vector.load %arg7[%c0_115, %c0_116] : memref<4x128xf32, #tpu.memory_space<vmem>>, vector<4x128xf32>
    tpu.vector_store %arg7[%c0_115, %c0_116], %158 {strides = array<i32>} : memref<4x128xf32, #tpu.memory_space<vmem>>, vector<4x128xf32>,
    return
  }
  func.func @transform_0(%arg0: i32, %arg1: memref<4x8xi32, #tpu.memory_space<smem>>) -> (i32, i32) {
    %c0_i32 = arith.constant 0 : i32
    %c0_i32_0 = arith.constant 0 : i32
    %c0_i32_1 = arith.constant 0 : i32
    return %c0_i32, %c0_i32_0 : i32, i32
  }
  func.func @transform_1(%arg0: i32, %arg1: memref<4x8xi32, #tpu.memory_space<smem>>) -> (i32, i32) {
    %c0_i32 = arith.constant 0 : i32
    %c0_i32_0 = arith.constant 0 : i32
    %c0_i32_1 = arith.constant 0 : i32
    return %c0_i32, %c0_i32_0 : i32, i32
  }
  func.func @transform_2(%arg0: i32, %arg1: memref<4x8xi32, #tpu.memory_space<smem>>) -> (i32, i32) {
    %c0_i32 = arith.constant 0 : i32
    %c0_i32_0 = arith.constant 0 : i32
    %c0_i32_1 = arith.constant 0 : i32
    return %c0_i32, %c0_i32_0 : i32, i32
  }
  func.func @transform_3(%arg0: i32, %arg1: memref<4x8xi32, #tpu.memory_space<smem>>) -> (i32, i32) {
    %c0_i32 = arith.constant 0 : i32
    %c0_i32_0 = arith.constant 0 : i32
    %c0_i32_1 = arith.constant 0 : i32
    return %c0_i32, %c0_i32_0 : i32, i32
  }
  func.func @transform_4(%arg0: i32, %arg1: memref<4x8xi32, #tpu.memory_space<smem>>) -> (i32, i32) {
    %c0_i32 = arith.constant 0 : i32
    %c0_i32_0 = arith.constant 0 : i32
    %c0_i32_1 = arith.constant 0 : i32
    return %c0_i32, %c0_i32_0 : i32, i32
  }
  func.func @transform_5(%arg0: i32, %arg1: memref<4x8xi32, #tpu.memory_space<smem>>) -> (i32, i32) {
    %c0_i32 = arith.constant 0 : i32
    %c0_i32_0 = arith.constant 0 : i32
    %c0_i32_1 = arith.constant 0 : i32
    return %c0_i32, %c0_i32_0 : i32, i32
  }
}

</mosaic_0001>

<bundles_post_ra>
// kernel: mlp_forward.1
= control target key start
LH: loop header
LB: loop body
LE: loop exit
PB: predicated region body
PF: predicated region fallthrough
CT: control target
= control target key end

     0   :  { %s387_s24 = smov [#allocation4]   ;;  %s593_s0 = inlined_call_operand.hbm [shape: s32[4,8], index: 0, kind: input, shape index: {}]   ;;  %s594_s1 = inlined_call_operand.vmem [shape: f32[32,16], index: 1, kind: input, shape index: {}]   ;;  %s595_s2 = inlined_call_operand.vmem [shape: f32[16,32], index: 2, kind: input, shape index: {}]   ;;  %s596_s3 = inlined_call_operand.vmem [shape: f32[1,32], index: 3, kind: input, shape index: {}]   ;;  %s597_s4 = inlined_call_operand.vmem [shape: f32[32,128], index: 4, kind: input, shape index: {}]   ;;  %s598_s5 = inlined_call_operand.vmem [shape: f32[1,128], index: 5, kind: input, shape index: {}]   ;;  %s599_s6 = inlined_call_operand.hbm [shape: f32[4,128], index: 6, kind: output, shape index: {}]  }
   0x1   :  { %s12_s23 = sshll.u32 %s593_s0, 4  ;;  %s13_s23 = int_to_ptr.hbm [resolvable:$true] %s12_s23 }
   0x2   :  { %15 = dma.hbm_to_smem %s13_s23, 64, %s387_s24, [#allocation3] }
   0x3   :  { %383 = dma.done.wait [#allocation3], 64 }
   0x4   :  { %384 = vsyncadd [#allocation3], 4294967232 }
   0x5   :  { %18 = sfence }
   0x6   :  { %v165_v0 = vld [vmem:[%s595_s2 + $0x8] sm:$0xff]  ;;  %v164_v1 = vld [vmem:[%s595_s2] sm:$0xff]  ;;  %s30_s29 = sld [smem:[#allocation4]] }
   0x7   :  { %188 = vmatpush.msra.mxu0 %v165_v0  ;;  %s304_s30 = sld [smem:[#allocation4 + $0x1]] }
   0x8   :  { %s305_s7 = sld [smem:[#allocation4 + $0x2]] }
   0x9   :  { %19 = vsyncpa [#allocation6], 0  ;;  %189 = vmatpush.msra.mxu0 %v164_v1  ;;  %s306_s0 = sld [smem:[#allocation4 + $0x3]]  ;;  %vm62_vm0 = vcmask 122880   ;;  %v197_v30 = vld [vmem:[%s597_s4 + $0x18] sm:$0xff]  ;;  %v196_v31 = vld [vmem:[%s597_s4 + $0x10] sm:$0xff] }
   0xa   :  { %s307_s8 = sld [smem:[#allocation4 + $0x4]]  ;;  %218 = vmatpush.msra.mxu1 %v197_v30  ;;  %vm170_vm1 = vcmask 130048   ;;  %v195_v1 = vld [vmem:[%s597_s4 + $0x8] sm:$0xff]  ;;  %vm202_vm2 = vcmask 261120   ;;  %vm232_vm3 = vcmask 1043456   ;;  %s263_s22 = sshll.u32 %s599_s6, 4  ;;  %s264_s22 = int_to_ptr.hbm [resolvable:$true] %s263_s22 }
   0xb   :  { %s308_s9 = sld [smem:[#allocation4 + $0x5]] }
   0xc   :  { %s31_s12 = scalar_lea.vmem %s594_s1, %s30_s29  ;;  %s436_s13 = sld [smem:[#allocation4 + $0x6]]  ;;  %219 = vmatpush.msra.mxu1 %v196_v31 }
   0xd   :  { %v32_v2 = vld [vmem:[%s31_s12] sm:$0x1]  ;;  %s35_s2 = scalar_lea.vmem %s594_s1, %s304_s30  ;;  %s441_s16 = sld [smem:[#allocation4 + $0x7]] }
   0xe   :  { %v36_v3 = vld [vmem:[%s35_s2] sm:$0x1]  ;;  %s39_s19 = scalar_lea.vmem %s594_s1, %s305_s7  ;;  %s311_s20 = sld [smem:[#allocation4 + $0x80]]  ;;  %220 = vmatpush.msra.mxu1 %v195_v1 }
   0xf   :  { %v37_v4 = vadd.f32 %v36_v3, %v32_v2  ;;  %v40_v5 = vld [vmem:[%s39_s19] sm:$0x1]  ;;  %s43_s23 = scalar_lea.vmem %s594_s1, %s306_s0  ;;  %s312_s24 = sld [smem:[#allocation4 + $0x81]] }
  0x10   :  { %v44_v6 = vld [vmem:[%s43_s23] sm:$0x1]  ;;  %s47_s27 = scalar_lea.vmem %s594_s1, %s307_s8  ;;  %s313_s28 = sld [smem:[#allocation4 + $0x82]] }
  0x11   :  { %v41_v7 = vadd.f32 %v40_v5, %v37_v4  ;;  %s51_s7 = scalar_lea.vmem %s594_s1, %s308_s9  ;;  %s314_s10 = sld [smem:[#allocation4 + $0x83]]  ;;  %v48_v8 = vld [vmem:[%s47_s27] sm:$0x1] }
  0x12   :  { %s55_s14 = scalar_lea.vmem %s594_s1, %s436_s13  ;;  %s459_s15 = sld [smem:[#allocation4 + $0x84]]  ;;  %v52_v10 = vld [vmem:[%s51_s7] sm:$0x1] }
  0x13   :  { %v45_v9 = vadd.f32 %v44_v6, %v41_v7  ;;  %s59_s17 = scalar_lea.vmem %s594_s1, %s441_s16  ;;  %s465_s8 = sld [smem:[#allocation4 + $0x85]]  ;;  %v56_v13 = vld [vmem:[%s55_s14] sm:$0x1] }
  0x14   :  { %s65_s9 = scalar_lea.vmem %s594_s1, %s311_s20  ;;  %s470_s21 = sld [smem:[#allocation4 + $0x86]]  ;;  %v60_v18 = vld [vmem:[%s59_s17] sm:$0x1] }
  0x15   :  { %v49_v11 = vadd.f32 %v48_v8, %v45_v9  ;;  %v66_v12 = vld [vmem:[%s65_s9] sm:$0x1]  ;;  %s69_s23 = scalar_lea.vmem %s594_s1, %s312_s24  ;;  %s475_s25 = sld [smem:[#allocation4 + $0x87]] }
  0x16   :  { %v70_v14 = vld [vmem:[%s69_s23] sm:$0x1]  ;;  %s73_s27 = scalar_lea.vmem %s594_s1, %s313_s28  ;;  %s319_s29 = sld [smem:[#allocation4 + $0x100]] }
  0x17   :  { %v53_v15 = vadd.f32 %v52_v10, %v49_v11  ;;  %v71_v16 = vadd.f32 %v70_v14, %v66_v12  ;;  %v74_v17 = vld [vmem:[%s73_s27] sm:$0x1]  ;;  %s77_s7 = scalar_lea.vmem %s594_s1, %s314_s10  ;;  %s320_s24 = sld [smem:[#allocation4 + $0x101]] }
  0x18   :  { %v78_v19 = vld [vmem:[%s77_s7] sm:$0x1]  ;;  %s81_s14 = scalar_lea.vmem %s594_s1, %s459_s15  ;;  %s487_s0 = sld [smem:[#allocation4 + $0x102]] }
  0x19   :  { %v57_v20 = vadd.f32 %v56_v13, %v53_v15  ;;  %v75_v21 = vadd.f32 %v74_v17, %v71_v16  ;;  %s85_s18 = scalar_lea.vmem %s594_s1, %s465_s8  ;;  %s493_s19 = sld [smem:[#allocation4 + $0x103]]  ;;  %v82_v22 = vld [vmem:[%s81_s14] sm:$0x1] }
  0x1a   :  { %s89_s17 = scalar_lea.vmem %s594_s1, %s470_s21  ;;  %s499_s13 = sld [smem:[#allocation4 + $0x104]]  ;;  %v86_v25 = vld [vmem:[%s85_s18] sm:$0x1] }
  0x1b   :  { %v61_v23 = vadd.f32 %v60_v18, %v57_v20  ;;  %v79_v24 = vadd.f32 %v78_v19, %v75_v21  ;;  %s93_s23 = scalar_lea.vmem %s594_s1, %s475_s25  ;;  %s505_s16 = sld [smem:[#allocation4 + $0x105]]  ;;  %v90_v26 = vld [vmem:[%s89_s17] sm:$0x1] }
  0x1c   :  { %s98_s27 = scalar_lea.vmem %s594_s1, %s319_s29  ;;  %s510_s20 = sld [smem:[#allocation4 + $0x106]]  ;;  %v94_v35 = vld [vmem:[%s93_s23] sm:$0x1] }
  0x1d   :  { %63 = vst.msk [vmem:[#allocation2] sm:$0x1] %vm62_vm0, %v61_v23  ;;  %v83_v27 = vadd.f32 %v82_v22, %v79_v24  ;;  %v99_v28 = vld [vmem:[%s98_s27] sm:$0x1]  ;;  %s102_s25 = scalar_lea.vmem %s594_s1, %s320_s24  ;;  %s516_s7 = sld [smem:[#allocation4 + $0x107]] }
  0x1e   :  { %v103_v29 = vld [vmem:[%s102_s25] sm:$0x1]  ;;  %s106_s14 = scalar_lea.vmem %s594_s1, %s487_s0  ;;  %s522_s29 = sld [smem:[#allocation4 + $0x180]] }
  0x1f   :  { %v87_v32 = vadd.f32 %v86_v25, %v83_v27  ;;  %v104_v33 = vadd.f32 %v103_v29, %v99_v28  ;;  %v107_v34 = vld [vmem:[%s106_s14] sm:$0x1]  ;;  %s110_s17 = scalar_lea.vmem %s594_s1, %s493_s19  ;;  %s328_s0 = sld [smem:[#allocation4 + $0x181]] }
  0x20   :  { %v111_v36 = vld [vmem:[%s110_s17] sm:$0x1]  ;;  %s114_s8 = scalar_lea.vmem %s594_s1, %s499_s13  ;;  %s329_s26 = sld [smem:[#allocation4 + $0x182]] }
  0x21   :  { %v91_v37 = vadd.f32 %v90_v26, %v87_v32  ;;  %v108_v38 = vadd.f32 %v107_v34, %v104_v33  ;;  %s118_s30 = scalar_lea.vmem %s594_s1, %s505_s16  ;;  %s330_s25 = sld [smem:[#allocation4 + $0x183]]  ;;  %v115_v39 = vld [vmem:[%s114_s8] sm:$0x1] }
  0x22   :  { %s122_s23 = scalar_lea.vmem %s594_s1, %s510_s20  ;;  %s331_s12 = sld [smem:[#allocation4 + $0x184]]  ;;  %v119_v42 = vld [vmem:[%s118_s30] sm:$0x1] }
  0x23   :  { %v95_v40 = vadd.f32 %v94_v35, %v91_v37  ;;  %v112_v41 = vadd.f32 %v111_v36, %v108_v38  ;;  %s126_s13 = scalar_lea.vmem %s594_s1, %s516_s7  ;;  %s332_s2 = sld [smem:[#allocation4 + $0x185]]  ;;  %v123_v45 = vld [vmem:[%s122_s23] sm:$0x1] }
  0x24   :  { %s131_s16 = scalar_lea.vmem %s594_s1, %s522_s29  ;;  %s333_s24 = sld [smem:[#allocation4 + $0x186]]  ;;  %v127_v50 = vld [vmem:[%s126_s13] sm:$0x1] }
  0x25   :  { %96 = vst.msk [vmem:[#allocation2 + $0x1] sm:$0x1] %vm62_vm0, %v95_v40  ;;  %v116_v43 = vadd.f32 %v115_v39, %v112_v41  ;;  %v132_v44 = vld [vmem:[%s131_s16] sm:$0x1]  ;;  %s135_s17 = scalar_lea.vmem %s594_s1, %s328_s0  ;;  %s334_s15 = sld [smem:[#allocation4 + $0x187]] }
  0x26   :  { %v136_v46 = vld [vmem:[%s135_s17] sm:$0x1]  ;;  %s139_s8 = scalar_lea.vmem %s594_s1, %s329_s26 }
  0x27   :  { %v120_v47 = vadd.f32 %v119_v42, %v116_v43  ;;  %v137_v48 = vadd.f32 %v136_v46, %v132_v44  ;;  %v140_v49 = vld [vmem:[%s139_s8] sm:$0x1]  ;;  %s143_s21 = scalar_lea.vmem %s594_s1, %s330_s25 }
  0x28   :  { %v144_v51 = vld [vmem:[%s143_s21] sm:$0x1]  ;;  %s147_s0 = scalar_lea.vmem %s594_s1, %s331_s12 }
  0x29   :  { %v124_v52 = vadd.f32 %v123_v45, %v120_v47  ;;  %v141_v53 = vadd.f32 %v140_v49, %v137_v48  ;;  %s151_s14 = scalar_lea.vmem %s594_s1, %s332_s2  ;;  %v148_v54 = vld [vmem:[%s147_s0] sm:$0x1] }
  0x2a   :  { %s155_s18 = scalar_lea.vmem %s594_s1, %s333_s24  ;;  %v152_v57 = vld [vmem:[%s151_s14] sm:$0x1] }
  0x2b   :  { %v128_v55 = vadd.f32 %v127_v50, %v124_v52  ;;  %v145_v56 = vadd.f32 %v144_v51, %v141_v53  ;;  %s159_s12 = scalar_lea.vmem %s594_s1, %s334_s15  ;;  %v156_v59 = vld [vmem:[%s155_s18] sm:$0x1] }
  0x2c   :  { %v160_v61 = vld [vmem:[%s159_s12] sm:$0x1] }
  0x2d   :  { %129 = vst.msk [vmem:[#allocation2 + $0x2] sm:$0x1] %vm62_vm0, %v128_v55  ;;  %v149_v58 = vadd.f32 %v148_v54, %v145_v56  ;;  %v194_v2 = vld [vmem:[%s597_s4] sm:$0xff] }
  0x2e   :  { %221 = vmatpush.msra.mxu1 %v194_v2  ;;  %v339_v3 = vld [vmem:[%s596_s3] ss:$0 sm:$0xff]  ;;  %s388_s3 = smov [#allocation5]  }
  0x2f   :  { %v153_v60 = vadd.f32 %v152_v57, %v149_v58  ;;  %v340_v6 = vld [vmem:[%s598_s5] ss:$0 sm:$0xff]  ;;  %s261_s4 = sshll.u32 %s388_s3, 4  ;;  %s262_s4 = int_to_ptr.vmem [resolvable:$true] %s261_s4 }
  0x31   :  { %v157_v62 = vadd.f32 %v156_v59, %v153_v60 }
  0x33   :  { %v161_v63 = vadd.f32 %v160_v61, %v157_v62 }
  0x35   :  { %162 = vst.msk [vmem:[#allocation2 + $0x3] sm:$0x1] %vm62_vm0, %v161_v63 }
  0x3c   :  { %v163_v0 = vld [vmem:[#allocation2] sm:$0xf] }
  0x3d   :  { %335 = vmatmul.msk.f32.vlgmr.msra.gmra.mxu0 %vm170_vm1, %v163_v0 }
  0xba   :  { %v191_v4 = vpop.f32.mrf.mxu0 }
  0xbb   :  { %v192_v5 = vadd.f32 %v339_v3, %v191_v4 }
  0xbd   :  { %336 = vmatmul.msk.f32.vlgmr.msra.gmra.mxu1 %vm202_vm2, %v192_v5 }
 0x13a   :  { %v223_v7 = vpop.f32.mrf.mxu1 }
 0x13b   :  { %v224_v8 = vadd.f32 %v340_v6, %v223_v7 }
 0x13d   :  { %v226_v9 = vmul.f32 0.5, %v224_v8 }
 0x13f   :  { %341 = vtanh.f32 %v226_v9 }
 0x145   :  { %v342_v10 = vpop.eup %341 }
 0x146   :  { %v228_v11 = vmul.f32 0.5, %v342_v10 }
 0x148   :  { %v229_v12 = vadd.f32 0.5, %v228_v11 }
 0x14a   :  { %v230_v13 = vmul.f32 1.442695, %v229_v12 }
 0x14c   :  { %343 = vpow2.f32 %v230_v13 }
 0x152   :  { %v344_v14 = vpop.eup %343 }
 0x153   :  { %v233_v15 = vsel %vm232_vm3, %v344_v14, 0.0 }
 0x154   :  { %v234_v16 = vrot.slane %v233_v15, 4 }
 0x156   :  { %v235_v17 = vadd.f32 %v234_v16, %v233_v15 }
 0x158   :  { %v236_v18 = vrot.slane %v235_v17, 2 }
 0x15a   :  { %v237_v19 = vadd.f32 %v236_v18, %v235_v17 }
 0x15c   :  { %v238_v20 = vrot.slane %v237_v19, 1 }
 0x15e   :  { %v239_v21 = vadd.f32 %v238_v20, %v237_v19 }
 0x160   :  { %345 = vrcp.f32 %v239_v21  ;;  %v251_v25 = vand.u32 2147483648, %v239_v21  ;;  %v249_v27 = vand.u32 2147483647, %v239_v21  ;;  %vm245_vm5 = vweird.f32 %v239_v21 }
 0x162   :  { %v252_v29 = vor.u32 1.1754944e-38, %v251_v25  ;;  %vm250_vm7 = vcmp.eq.f32.partialorder %v249_v27, 8.507059e+37 }
 0x166   :  { %v346_v22 = vpop.eup %345 }
 0x167   :  { %v241_v23 = vmul.f32 %v346_v22, %v239_v21  ;;  %vm246_vm4 = vweird.f32 %v346_v22 }
 0x168   :  { %vm247_vm6 = vmor %vm245_vm5, %vm246_vm4 }
 0x169   :  { %v242_v24 = vsub.f32 1.0, %v241_v23 }
 0x16b   :  { %v243_v26 = vmul.f32 %v346_v22, %v242_v24 }
 0x16d   :  { %v244_v28 = vadd.f32 %v346_v22, %v243_v26 }
 0x16f   :  { %v248_v30 = vsel %vm247_vm6, %v346_v22, %v244_v28 }
 0x170   :  { %v253_v31 = vsel %vm250_vm7, %v252_v29, %v248_v30 }
 0x171   :  { %v254_v32 = vmul.f32 %v344_v14, %v253_v31 }
 0x173   :  { %255 = vst [vmem:[#allocation5] sm:$0xf] %v254_v32 }
 0x174   :  { %266 = dma.vmem_to_hbm [thread:$0]  %s262_s4, 64, %s264_s22, [#allocation6]  }
 0x175   :  { %385 = dma.done.wait [#allocation6], 64  }
 0x176   :  { %386 = vsyncadd [#allocation6], 4294967232 }
 0x177   :  { %271 = vsyncpa [#allocation6], 1 }

</bundles_post_ra>
